<compile_context>
chip_gen: v5e
topology: v5e:2x2
jax: 0.10.0
libtpu: 0.0.40
codegen_flags: <defaults>
</compile_context>

<pallas_src>
import functools

import jax
import jax.numpy as jnp
from jax.experimental import pallas as pl
from jax.experimental.pallas import tpu as pltpu


# --------------------------------------------------------------------------
# Kernel
# --------------------------------------------------------------------------
def mmoe_kernel(x_ref, oh_ref, attw_ref,
                w1_ref, b1_ref, w2_ref, b2_ref,
                wh_ref, bh_ref, out_ref,
                *, num_expert, num_head, m2):
    f32 = jnp.float32
    bf16 = jnp.bfloat16

    x = x_ref[...]                                     # (TB, S, E) f32
    oh = oh_ref[...]                                   # (TB, H)    f32 one-hot(D)

    # ---------------- MaskAttention (VPU/XLU, f32) ----------------
    row_sum = jnp.sum(x, axis=-1)                      # (TB, S)
    scores = jnp.sum(x * attw_ref[...], axis=-1)       # (TB, S)  Linear(E,1,bias=False)
    scores = jnp.where(row_sum == 0.0, -jnp.inf, scores)
    m = jnp.max(scores, axis=-1, keepdims=True)
    e = jnp.exp(scores - m)
    p = e * pl.reciprocal(jnp.sum(e, axis=-1, keepdims=True), approx=True)
    feature = jnp.sum(p[..., None] * x, axis=1)        # (TB, E)

    tb = feature.shape[0]
    f_bf = feature.astype(bf16)

    # ------------- Layer 1 (experts + gates fused into ONE matmul) -------------
    # expert layer-1: Linear -> BN(eval, folded) -> ReLU ; gate layer-1: Linear -> ReLU
    c1 = jnp.dot(f_bf, w1_ref[...], preferred_element_type=f32) + b1_ref[...]   # (TB, X*M1 + H*M2)
    c1 = jnp.maximum(c1, 0.0)

    # ------------- Layer 2 (experts + gates fused into ONE block-diag matmul) ---
    c2 = (jnp.dot(c1.astype(bf16), w2_ref[...], preferred_element_type=f32)
          + b2_ref[...])                                                         # (TB, X*M2 + H*X)
    xm2 = num_expert * m2                               # lane-aligned split point
    h2 = jnp.maximum(c2[:, :xm2], 0.0)                  # expert outputs (TB, X*M2)
    g2 = c2[:, xm2:]                                    # gate logits, H heads back-to-back

    # per-sample head selection of gate logits (one-hot mix), then ONE softmax
    gl = jnp.zeros((tb, num_expert), f32)
    for h in range(num_head):                           # VPU, static lane slices
        gl = gl + oh[:, h:h + 1] * g2[:, h * num_expert:(h + 1) * num_expert]
    gm = jnp.max(gl, axis=-1, keepdims=True)
    ge = jnp.exp(gl - gm)
    gate_val = ge * pl.reciprocal(jnp.sum(ge, axis=-1, keepdims=True), approx=True)

    # gate-weighted mixture of experts (VPU)
    rep = jnp.zeros((tb, m2), f32)
    for ex in range(num_expert):
        rep = rep + gate_val[:, ex:ex + 1] * h2[:, ex * m2:(ex + 1) * m2]

    # ---------------- Heads: one fused matmul + one-hot mix + softmax ----------------
    ho = (jnp.dot(rep.astype(bf16), wh_ref[...], preferred_element_type=f32)
          + bh_ref[...])                                                         # (TB, H*2)
    logits = jnp.zeros((tb, 2), f32)
    for h in range(num_head):
        logits = logits + oh[:, h:h + 1] * ho[:, 2 * h:2 * h + 2]
    om = jnp.max(logits, axis=-1, keepdims=True)
    oe = jnp.exp(logits - om)
    out_ref[...] = oe / jnp.sum(oe, axis=-1, keepdims=True)


# --------------------------------------------------------------------------
# Wrapper
# --------------------------------------------------------------------------
def _round_up(v, m):
    return ((v + m - 1) // m) * m


def mmoe_forward(x, D, fused, *, num_expert, num_head, mlp_dims, tile_b=256):
    B, S, E = x.shape
    H = num_head
    M2 = mlp_dims[-1]

    tb = _round_up(min(tile_b, _round_up(B, 8)), 8)
    Bp = _round_up(B, tb)
    if Bp != B:
        # pad with a nonzero constant so padded rows stay finite (they are sliced off)
        x = jnp.pad(x, ((0, Bp - B), (0, 0), (0, 0)), constant_values=1.0)
        D = jnp.pad(D, (0, Bp - B))
    oh = jax.nn.one_hot(D, H, dtype=jnp.float32)       # glue: one-hot of domain ids

    weights = (fused["att_w"],
               fused["w1"], fused["b1"], fused["w2"], fused["b2"],
               fused["wh"], fused["bh"])

    def const_spec(a):
        # full-array block, constant index_map -> stays VMEM-resident across grid steps
        return pl.BlockSpec(a.shape, lambda i, _nd=a.ndim: (0,) * _nd)

    in_specs = ([pl.BlockSpec((tb, S, E), lambda i: (i, 0, 0)),
                 pl.BlockSpec((tb, H), lambda i: (i, 0))]
                + [const_spec(w) for w in weights])
    out_spec = pl.BlockSpec((tb, 2), lambda i: (i, 0))

    # VMEM budget: resident weights + double-buffered x/oh/out tiles + headroom,
    # capped below v7x's 64 MiB physical VMEM.
    w_bytes = sum(int(w.size) * w.dtype.itemsize for w in weights)
    io_bytes = 2 * (tb * S * E + tb * H + tb * 2) * 4
    vmem_limit = int(min(48 * 2 ** 20, max(16 * 2 ** 20, w_bytes + io_bytes + (4 << 20))))

    kernel = functools.partial(mmoe_kernel, num_expert=num_expert,
                               num_head=num_head, m2=M2)
    out = pl.pallas_call(
        kernel,
        out_shape=jax.ShapeDtypeStruct((Bp, 2), jnp.float32),
        grid=(Bp // tb,),
        in_specs=in_specs,
        out_specs=out_spec,
        compiler_params=pltpu.CompilerParams(
            dimension_semantics=("parallel",),      # shards batch tiles across v7x's 2 TCs
            vmem_limit_bytes=vmem_limit),
    )(x, oh, *weights)
    return out[:B]


# --------------------------------------------------------------------------
# Parameters: PyTorch-equivalent raw params + host-side fusion
# --------------------------------------------------------------------------
def _linear_init(key, fan_in, fan_out):
    """PyTorch nn.Linear default init: U(-1/sqrt(fan_in), 1/sqrt(fan_in))."""
    k1, k2 = jax.random.split(key)
    bound = 1.0 / (fan_in ** 0.5)
    w = jax.random.uniform(k1, (fan_in, fan_out), jnp.float32, -bound, bound)
    b = jax.random.uniform(k2, (fan_out,), jnp.float32, -bound, bound)
    return w, b


def make_params(key, emb_dim, mlp_dims, num_expert, num_head):
    """Raw (PyTorch-layout) parameters; BN buffers at eval-mode defaults."""
    M1, M2 = mlp_dims
    kit = iter(jax.random.split(key, 1 + 2 * num_expert + 3 * num_head))

    att_w, _ = _linear_init(next(kit), emb_dim, 1)           # Linear(E,1,bias=False)

    we1, be1, we2, be2 = [], [], [], []
    for _ in range(num_expert):
        w, b = _linear_init(next(kit), emb_dim, M1); we1.append(w); be1.append(b)
        w, b = _linear_init(next(kit), M1, M2);      we2.append(w); be2.append(b)

    wg1, bg1, wg2, bg2 = [], [], [], []
    for _ in range(num_head):
        w, b = _linear_init(next(kit), emb_dim, M2);       wg1.append(w); bg1.append(b)
        w, b = _linear_init(next(kit), M2, num_expert);    wg2.append(w); bg2.append(b)

    wh, bh = [], []
    for _ in range(num_head):
        w, b = _linear_init(next(kit), M2, 2); wh.append(w); bh.append(b)

    return dict(
        att_w=att_w,
        we1=jnp.stack(we1), be1=jnp.stack(be1),
        we2=jnp.stack(we2), be2=jnp.stack(be2),
        wg1=jnp.stack(wg1), bg1=jnp.stack(bg1),
        wg2=jnp.stack(wg2), bg2=jnp.stack(bg2),
        wh=jnp.stack(wh), bh=jnp.stack(bh),
        # BatchNorm1d eval-mode buffers at defaults: gamma=1, beta=0, mean=0, var=1
        bn_eps=1e-5,
    )


def _block_diag(blocks):
    """General block-diagonal (blocks may have different shapes)."""
    rows = sum(b.shape[0] for b in blocks)
    cols = sum(b.shape[1] for b in blocks)
    out = jnp.zeros((rows, cols), blocks[0].dtype)
    r = c = 0
    for b in blocks:
        out = out.at[r:r + b.shape[0], c:c + b.shape[1]].set(b)
        r += b.shape[0]; c += b.shape[1]
    return out


def fuse_params(p, *, num_expert, num_head, mlp_dims):
    """Fold eval-mode BN into the expert Linears and fuse ALL per-expert /
    per-head weights into 3 matmul operands:
      w1 = [we1_fused | wg1_fused]                      (E, X*M1 + H*M2)
      w2 = blockdiag(we2_0..we2_{X-1}, wg2_0..wg2_{H-1}) (X*M1+H*M2, X*M2+H*X)
      wh = per-head output heads concatenated            (M2, H*2)
    Matmul weights are cast to bf16 (f32 accumulation in-kernel)."""
    M1, M2 = mlp_dims
    X, H = num_expert, num_head
    bf16 = jnp.bfloat16

    # eval-mode BN with default buffers: y = x / sqrt(1 + eps)  ->  fold into Linear
    bn_scale = 1.0 / jnp.sqrt(jnp.float32(1.0) + p["bn_eps"])
    we1 = p["we1"] * bn_scale          # (X, E, M1)
    be1 = p["be1"] * bn_scale          # (X, M1)
    we2 = p["we2"] * bn_scale          # (X, M1, M2)
    be2 = p["be2"] * bn_scale          # (X, M2)

    E = we1.shape[1]
    we1_f = jnp.transpose(we1, (1, 0, 2)).reshape(E, X * M1)
    wg1_f = jnp.transpose(p["wg1"], (1, 0, 2)).reshape(E, H * M2)
    w1 = jnp.concatenate([we1_f, wg1_f], axis=1)                     # (E, X*M1 + H*M2)
    b1 = jnp.concatenate([be1.reshape(1, X * M1),
                          p["bg1"].reshape(1, H * M2)], axis=1)

    w2 = _block_diag([we2[i] for i in range(X)]
                     + [p["wg2"][i] for i in range(H)])              # (X*M1+H*M2, X*M2+H*X)
    b2 = jnp.concatenate([be2.reshape(1, X * M2),
                          p["bg2"].reshape(1, H * X)], axis=1)

    wh_f = jnp.transpose(p["wh"], (1, 0, 2)).reshape(M2, H * 2)
    bh_f = p["bh"].reshape(1, H * 2)

    return dict(
        att_w=p["att_w"].reshape(1, 1, E),                           # f32 (VPU path)
        w1=w1.astype(bf16), b1=b1,
        w2=w2.astype(bf16), b2=b2,
        wh=wh_f.astype(bf16), bh=bh_f,
    )


# --------------------------------------------------------------------------
# Pure-JAX f32 reference (mirrors the PyTorch module, eval mode)
# --------------------------------------------------------------------------
def mmoe_reference(x, D, p, *, num_expert, num_head):
    bn = 1.0 / jnp.sqrt(1.0 + p["bn_eps"])
    scores = jnp.einsum("bse,e->bs", x, p["att_w"][:, 0])
    scores = jnp.where(jnp.sum(x, -1) == 0.0, -jnp.inf, scores)
    attn = jax.nn.softmax(scores, axis=-1)
    feature = jnp.einsum("bs,bse->be", attn, x)

    def expert(i, f):
        h = jnp.maximum((f @ p["we1"][i] + p["be1"][i]) * bn, 0.0)
        return jnp.maximum((h @ p["we2"][i] + p["be2"][i]) * bn, 0.0)

    def gate(i, f):
        h = jnp.maximum(f @ p["wg1"][i] + p["bg1"][i], 0.0)
        return jax.nn.softmax(h @ p["wg2"][i] + p["bg2"][i], axis=-1)

    oh = jax.nn.one_hot(D, num_head, dtype=jnp.float32)
    gates = jnp.stack([gate(i, feature) for i in range(num_head)], axis=1)    # (B,H,X)
    gate_val = jnp.einsum("bh,bhx->bx", oh, gates)
    rep = sum(gate_val[:, i:i + 1] * expert(i, feature) for i in range(num_expert))
    heads = jnp.stack([rep @ p["wh"][i] + p["bh"][i] for i in range(num_head)], axis=1)
    logits = jnp.einsum("bh,bhc->bc", oh, heads)
    return jax.nn.softmax(logits, axis=-1)


# --------------------------------------------------------------------------
if __name__ == "__main__":
    key = jax.random.PRNGKey(0)
    B, S, E = 8, 8, 32
    mlp_dims = (64, 32)
    num_expert, num_head = 4, 3

    k_x, k_d, k_p = jax.random.split(key, 3)
    x = jax.random.normal(k_x, (B, S, E), jnp.float32)
    D = jax.random.randint(k_d, (B,), 0, num_head, jnp.int32)

    params = make_params(k_p, E, mlp_dims, num_expert, num_head)
    fused = fuse_params(params, num_expert=num_expert, num_head=num_head, mlp_dims=mlp_dims)

    out = mmoe_forward(x, D, fused, num_expert=num_expert, num_head=num_head,
                       mlp_dims=mlp_dims)
    out = jax.block_until_ready(out)

    # sanity: shape, finiteness, rows sum to 1, matches f32 reference (bf16 MXU tolerance)
    ref = mmoe_reference(x, D, params, num_expert=num_expert, num_head=num_head)
    assert out.shape == (B, 2)
    assert bool(jnp.all(jnp.isfinite(out)))
    assert bool(jnp.all(jnp.abs(jnp.sum(out, axis=-1) - 1.0) < 1e-3))
    assert bool(jnp.all(jnp.abs(out - ref) < 3e-2)), "mismatch vs pure-JAX reference"
    print("KERNEL_OK")
</pallas_src>

<mosaic_0001>
module attributes {stable_mosaic.version = 11 : i64} {
  func.func @mmoe_kernel(%arg0: i32, %arg1: memref<8x8x32xf32, #tpu.memory_space<vmem>>, %arg2: memref<8x3xf32, #tpu.memory_space<vmem>>, %arg3: memref<1x1x32xf32, #tpu.memory_space<vmem>>, %arg4: memref<32x352xbf16, #tpu.memory_space<vmem>>, %arg5: memref<1x352xf32, #tpu.memory_space<vmem>>, %arg6: memref<352x140xbf16, #tpu.memory_space<vmem>>, %arg7: memref<1x140xf32, #tpu.memory_space<vmem>>, %arg8: memref<32x6xbf16, #tpu.memory_space<vmem>>, %arg9: memref<1x6xf32, #tpu.memory_space<vmem>>, %arg10: memref<8x2xf32, #tpu.memory_space<vmem>>) attributes {dimension_semantics = [#tpu.dimension_semantics<parallel>], iteration_bounds = array<i64: 1>, scalar_prefetch = 0 : i64, scratch_operands = 0 : i64, tpu.core_type = #tpu.core_type<tc>, window_params = [{transform_indices = @transform_0, window_bounds = array<i64: 8, 8, 32>}, {transform_indices = @transform_1, window_bounds = array<i64: 8, 3>}, {pipeline_mode = #tpu.pipeline_mode<synchronous>, transform_indices = @transform_2, window_bounds = array<i64: 1, 1, 32>}, {pipeline_mode = #tpu.pipeline_mode<synchronous>, transform_indices = @transform_3, window_bounds = array<i64: 32, 352>}, {pipeline_mode = #tpu.pipeline_mode<synchronous>, transform_indices = @transform_4, window_bounds = array<i64: 1, 352>}, {pipeline_mode = #tpu.pipeline_mode<synchronous>, transform_indices = @transform_5, window_bounds = array<i64: 352, 140>}, {pipeline_mode = #tpu.pipeline_mode<synchronous>, transform_indices = @transform_6, window_bounds = array<i64: 1, 140>}, {pipeline_mode = #tpu.pipeline_mode<synchronous>, transform_indices = @transform_7, window_bounds = array<i64: 32, 6>}, {pipeline_mode = #tpu.pipeline_mode<synchronous>, transform_indices = @transform_8, window_bounds = array<i64: 1, 6>}, {transform_indices = @transform_9, window_bounds = array<i64: 8, 2>}]} {
    %c0 = arith.constant 0 : index
    %c0_0 = arith.constant 0 : index
    %c0_1 = arith.constant 0 : index
    %0 = vector.load %arg1[%c0, %c0_0, %c0_1] : memref<8x8x32xf32, #tpu.memory_space<vmem>>, vector<8x8x32xf32>
    %c0_2 = arith.constant 0 : index
    %c0_3 = arith.constant 0 : index
    %1 = vector.load %arg2[%c0_2, %c0_3] : memref<8x3xf32, #tpu.memory_space<vmem>>, vector<8x3xf32>
    %cst = arith.constant dense<0.000000e+00> : vector<8x8xf32>
    %2 = vector.multi_reduction <add>, %0, %cst [2] : vector<8x8x32xf32> to vector<8x8xf32>
    %c0_4 = arith.constant 0 : index
    %c0_5 = arith.constant 0 : index
    %c0_6 = arith.constant 0 : index
    %3 = vector.load %arg3[%c0_4, %c0_5, %c0_6] : memref<1x1x32xf32, #tpu.memory_space<vmem>>, vector<1x1x32xf32>
    %4 = vector.broadcast %3 : vector<1x1x32xf32> to vector<8x8x32xf32>
    %5 = arith.mulf %0, %4 : vector<8x8x32xf32>
    %cst_7 = arith.constant dense<0.000000e+00> : vector<8x8xf32>
    %6 = vector.multi_reduction <add>, %5, %cst_7 [2] : vector<8x8x32xf32> to vector<8x8xf32>
    %cst_8 = arith.constant 0.000000e+00 : f32
    %7 = vector.broadcast %cst_8 : f32 to vector<8x8xf32>
    %8 = arith.cmpf oeq, %2, %7 : vector<8x8xf32>
    %cst_9 = arith.constant 0xFF800000 : f32
    %9 = vector.broadcast %cst_9 : f32 to vector<8x8xf32>
    %10 = arith.select %8, %9, %6 : vector<8x8xi1>, vector<8x8xf32>
    %cst_10 = arith.constant dense<0xFF800000> : vector<8xf32>
    %11 = vector.multi_reduction <maximumf>, %10, %cst_10 [1] : vector<8x8xf32> to vector<8xf32>
    %12 = vector.shape_cast %11 : vector<8xf32> to vector<8x1xf32>
    %13 = vector.broadcast %12 : vector<8x1xf32> to vector<8x8xf32>
    %14 = arith.subf %10, %13 : vector<8x8xf32>
    %15 = math.exp %14 : vector<8x8xf32>
    %cst_11 = arith.constant dense<0.000000e+00> : vector<8xf32>
    %16 = vector.multi_reduction <add>, %15, %cst_11 [1] : vector<8x8xf32> to vector<8xf32>
    %17 = vector.shape_cast %16 : vector<8xf32> to vector<8x1xf32>
    %18 = tpu.reciprocal %17 {approx = true} : vector<8x1xf32> -> vector<8x1xf32>
    %19 = vector.broadcast %18 : vector<8x1xf32> to vector<8x8xf32>
    %20 = arith.mulf %15, %19 : vector<8x8xf32>
    %21 = vector.shape_cast %20 : vector<8x8xf32> to vector<8x8x1xf32>
    %22 = vector.broadcast %21 : vector<8x8x1xf32> to vector<8x8x32xf32>
    %23 = arith.mulf %22, %0 : vector<8x8x32xf32>
    %cst_12 = arith.constant dense<0.000000e+00> : vector<8x32xf32>
    %24 = vector.multi_reduction <add>, %23, %cst_12 [1] : vector<8x8x32xf32> to vector<8x32xf32>
    %25 = arith.truncf %24 : vector<8x32xf32> to vector<8x32xbf16>
    %c0_13 = arith.constant 0 : index
    %c0_14 = arith.constant 0 : index
    %26 = vector.load %arg4[%c0_13, %c0_14] : memref<32x352xbf16, #tpu.memory_space<vmem>>, vector<32x352xbf16>
    %cst_15 = arith.constant dense<0.000000e+00> : vector<8x352xf32>
    %27 = tpu.matmul %25, %26, %cst_15 {dimension_numbers = #tpu.dot_dimension_numbers<[1], [0], [0], [1], [0, 0, 1, 1], [], []>} : vector<8x32xbf16>, vector<32x352xbf16>, vector<8x352xf32> -> vector<8x352xf32>
    %c0_16 = arith.constant 0 : index
    %c0_17 = arith.constant 0 : index
    %28 = vector.load %arg5[%c0_16, %c0_17] : memref<1x352xf32, #tpu.memory_space<vmem>>, vector<1x352xf32>
    %29 = vector.broadcast %28 : vector<1x352xf32> to vector<8x352xf32>
    %30 = arith.addf %27, %29 : vector<8x352xf32>
    %cst_18 = arith.constant 0.000000e+00 : f32
    %31 = vector.broadcast %cst_18 : f32 to vector<8x352xf32>
    %32 = arith.maximumf %30, %31 : vector<8x352xf32>
    %33 = arith.truncf %32 : vector<8x352xf32> to vector<8x352xbf16>
    %c0_19 = arith.constant 0 : index
    %c0_20 = arith.constant 0 : index
    %34 = vector.load %arg6[%c0_19, %c0_20] : memref<352x140xbf16, #tpu.memory_space<vmem>>, vector<352x140xbf16>
    %cst_21 = arith.constant dense<0.000000e+00> : vector<8x140xf32>
    %35 = tpu.matmul %33, %34, %cst_21 {dimension_numbers = #tpu.dot_dimension_numbers<[1], [0], [0], [1], [0, 0, 1, 1], [], []>} : vector<8x352xbf16>, vector<352x140xbf16>, vector<8x140xf32> -> vector<8x140xf32>
    %c0_22 = arith.constant 0 : index
    %c0_23 = arith.constant 0 : index
    %36 = vector.load %arg7[%c0_22, %c0_23] : memref<1x140xf32, #tpu.memory_space<vmem>>, vector<1x140xf32>
    %37 = vector.broadcast %36 : vector<1x140xf32> to vector<8x140xf32>
    %38 = arith.addf %35, %37 : vector<8x140xf32>
    %39 = vector.extract_strided_slice %38 {offsets = [0, 0], sizes = [8, 128], strides = [1, 1]} : vector<8x140xf32> to vector<8x128xf32>
    %cst_24 = arith.constant 0.000000e+00 : f32
    %40 = vector.broadcast %cst_24 : f32 to vector<8x128xf32>
    %41 = arith.maximumf %39, %40 : vector<8x128xf32>
    %42 = vector.extract_strided_slice %38 {offsets = [0, 128], sizes = [8, 12], strides = [1, 1]} : vector<8x140xf32> to vector<8x12xf32>
    %cst_25 = arith.constant 0.000000e+00 : f32
    %43 = vector.broadcast %cst_25 : f32 to vector<8x4xf32>
    %44 = vector.extract_strided_slice %1 {offsets = [0, 0], sizes = [8, 1], strides = [1, 1]} : vector<8x3xf32> to vector<8x1xf32>
    %45 = vector.extract_strided_slice %42 {offsets = [0, 0], sizes = [8, 4], strides = [1, 1]} : vector<8x12xf32> to vector<8x4xf32>
    %46 = vector.broadcast %44 : vector<8x1xf32> to vector<8x4xf32>
    %47 = arith.mulf %46, %45 : vector<8x4xf32>
    %48 = arith.addf %43, %47 : vector<8x4xf32>
    %49 = vector.extract_strided_slice %1 {offsets = [0, 1], sizes = [8, 1], strides = [1, 1]} : vector<8x3xf32> to vector<8x1xf32>
    %50 = vector.extract_strided_slice %42 {offsets = [0, 4], sizes = [8, 4], strides = [1, 1]} : vector<8x12xf32> to vector<8x4xf32>
    %51 = vector.broadcast %49 : vector<8x1xf32> to vector<8x4xf32>
    %52 = arith.mulf %51, %50 : vector<8x4xf32>
    %53 = arith.addf %48, %52 : vector<8x4xf32>
    %54 = vector.extract_strided_slice %1 {offsets = [0, 2], sizes = [8, 1], strides = [1, 1]} : vector<8x3xf32> to vector<8x1xf32>
    %55 = vector.extract_strided_slice %42 {offsets = [0, 8], sizes = [8, 4], strides = [1, 1]} : vector<8x12xf32> to vector<8x4xf32>
    %56 = vector.broadcast %54 : vector<8x1xf32> to vector<8x4xf32>
    %57 = arith.mulf %56, %55 : vector<8x4xf32>
    %58 = arith.addf %53, %57 : vector<8x4xf32>
    %cst_26 = arith.constant dense<0xFF800000> : vector<8xf32>
    %59 = vector.multi_reduction <maximumf>, %58, %cst_26 [1] : vector<8x4xf32> to vector<8xf32>
    %60 = vector.shape_cast %59 : vector<8xf32> to vector<8x1xf32>
    %61 = vector.broadcast %60 : vector<8x1xf32> to vector<8x4xf32>
    %62 = arith.subf %58, %61 : vector<8x4xf32>
    %63 = math.exp %62 : vector<8x4xf32>
    %cst_27 = arith.constant dense<0.000000e+00> : vector<8xf32>
    %64 = vector.multi_reduction <add>, %63, %cst_27 [1] : vector<8x4xf32> to vector<8xf32>
    %65 = vector.shape_cast %64 : vector<8xf32> to vector<8x1xf32>
    %66 = tpu.reciprocal %65 {approx = true} : vector<8x1xf32> -> vector<8x1xf32>
    %67 = vector.broadcast %66 : vector<8x1xf32> to vector<8x4xf32>
    %68 = arith.mulf %63, %67 : vector<8x4xf32>
    %cst_28 = arith.constant 0.000000e+00 : f32
    %69 = vector.broadcast %cst_28 : f32 to vector<8x32xf32>
    %70 = vector.extract_strided_slice %68 {offsets = [0, 0], sizes = [8, 1], strides = [1, 1]} : vector<8x4xf32> to vector<8x1xf32>
    %71 = vector.extract_strided_slice %41 {offsets = [0, 0], sizes = [8, 32], strides = [1, 1]} : vector<8x128xf32> to vector<8x32xf32>
    %72 = vector.broadcast %70 : vector<8x1xf32> to vector<8x32xf32>
    %73 = arith.mulf %72, %71 : vector<8x32xf32>
    %74 = arith.addf %69, %73 : vector<8x32xf32>
    %75 = vector.extract_strided_slice %68 {offsets = [0, 1], sizes = [8, 1], strides = [1, 1]} : vector<8x4xf32> to vector<8x1xf32>
    %76 = vector.extract_strided_slice %41 {offsets = [0, 32], sizes = [8, 32], strides = [1, 1]} : vector<8x128xf32> to vector<8x32xf32>
    %77 = vector.broadcast %75 : vector<8x1xf32> to vector<8x32xf32>
    %78 = arith.mulf %77, %76 : vector<8x32xf32>
    %79 = arith.addf %74, %78 : vector<8x32xf32>
    %80 = vector.extract_strided_slice %68 {offsets = [0, 2], sizes = [8, 1], strides = [1, 1]} : vector<8x4xf32> to vector<8x1xf32>
    %81 = vector.extract_strided_slice %41 {offsets = [0, 64], sizes = [8, 32], strides = [1, 1]} : vector<8x128xf32> to vector<8x32xf32>
    %82 = vector.broadcast %80 : vector<8x1xf32> to vector<8x32xf32>
    %83 = arith.mulf %82, %81 : vector<8x32xf32>
    %84 = arith.addf %79, %83 : vector<8x32xf32>
    %85 = vector.extract_strided_slice %68 {offsets = [0, 3], sizes = [8, 1], strides = [1, 1]} : vector<8x4xf32> to vector<8x1xf32>
    %86 = vector.extract_strided_slice %41 {offsets = [0, 96], sizes = [8, 32], strides = [1, 1]} : vector<8x128xf32> to vector<8x32xf32>
    %87 = vector.broadcast %85 : vector<8x1xf32> to vector<8x32xf32>
    %88 = arith.mulf %87, %86 : vector<8x32xf32>
    %89 = arith.addf %84, %88 : vector<8x32xf32>
    %90 = arith.truncf %89 : vector<8x32xf32> to vector<8x32xbf16>
    %c0_29 = arith.constant 0 : index
    %c0_30 = arith.constant 0 : index
    %91 = vector.load %arg8[%c0_29, %c0_30] : memref<32x6xbf16, #tpu.memory_space<vmem>>, vector<32x6xbf16>
    %cst_31 = arith.constant dense<0.000000e+00> : vector<8x6xf32>
    %92 = tpu.matmul %90, %91, %cst_31 {dimension_numbers = #tpu.dot_dimension_numbers<[1], [0], [0], [1], [0, 0, 1, 1], [], []>} : vector<8x32xbf16>, vector<32x6xbf16>, vector<8x6xf32> -> vector<8x6xf32>
    %c0_32 = arith.constant 0 : index
    %c0_33 = arith.constant 0 : index
    %93 = vector.load %arg9[%c0_32, %c0_33] : memref<1x6xf32, #tpu.memory_space<vmem>>, vector<1x6xf32>
    %94 = vector.broadcast %93 : vector<1x6xf32> to vector<8x6xf32>
    %95 = arith.addf %92, %94 : vector<8x6xf32>
    %cst_34 = arith.constant 0.000000e+00 : f32
    %96 = vector.broadcast %cst_34 : f32 to vector<8x2xf32>
    %97 = vector.extract_strided_slice %1 {offsets = [0, 0], sizes = [8, 1], strides = [1, 1]} : vector<8x3xf32> to vector<8x1xf32>
    %98 = vector.extract_strided_slice %95 {offsets = [0, 0], sizes = [8, 2], strides = [1, 1]} : vector<8x6xf32> to vector<8x2xf32>
    %99 = vector.broadcast %97 : vector<8x1xf32> to vector<8x2xf32>
    %100 = arith.mulf %99, %98 : vector<8x2xf32>
    %101 = arith.addf %96, %100 : vector<8x2xf32>
    %102 = vector.extract_strided_slice %1 {offsets = [0, 1], sizes = [8, 1], strides = [1, 1]} : vector<8x3xf32> to vector<8x1xf32>
    %103 = vector.extract_strided_slice %95 {offsets = [0, 2], sizes = [8, 2], strides = [1, 1]} : vector<8x6xf32> to vector<8x2xf32>
    %104 = vector.broadcast %102 : vector<8x1xf32> to vector<8x2xf32>
    %105 = arith.mulf %104, %103 : vector<8x2xf32>
    %106 = arith.addf %101, %105 : vector<8x2xf32>
    %107 = vector.extract_strided_slice %1 {offsets = [0, 2], sizes = [8, 1], strides = [1, 1]} : vector<8x3xf32> to vector<8x1xf32>
    %108 = vector.extract_strided_slice %95 {offsets = [0, 4], sizes = [8, 2], strides = [1, 1]} : vector<8x6xf32> to vector<8x2xf32>
    %109 = vector.broadcast %107 : vector<8x1xf32> to vector<8x2xf32>
    %110 = arith.mulf %109, %108 : vector<8x2xf32>
    %111 = arith.addf %106, %110 : vector<8x2xf32>
    %cst_35 = arith.constant dense<0xFF800000> : vector<8xf32>
    %112 = vector.multi_reduction <maximumf>, %111, %cst_35 [1] : vector<8x2xf32> to vector<8xf32>
    %113 = vector.shape_cast %112 : vector<8xf32> to vector<8x1xf32>
    %114 = vector.broadcast %113 : vector<8x1xf32> to vector<8x2xf32>
    %115 = arith.subf %111, %114 : vector<8x2xf32>
    %116 = math.exp %115 : vector<8x2xf32>
    %cst_36 = arith.constant dense<0.000000e+00> : vector<8xf32>
    %117 = vector.multi_reduction <add>, %116, %cst_36 [1] : vector<8x2xf32> to vector<8xf32>
    %118 = vector.shape_cast %117 : vector<8xf32> to vector<8x1xf32>
    %119 = vector.broadcast %118 : vector<8x1xf32> to vector<8x2xf32>
    %120 = arith.divf %116, %119 : vector<8x2xf32>
    %c0_37 = arith.constant 0 : index
    %c0_38 = arith.constant 0 : index
    %121 = vector.load %arg10[%c0_37, %c0_38] : memref<8x2xf32, #tpu.memory_space<vmem>>, vector<8x2xf32>
    tpu.vector_store %arg10[%c0_37, %c0_38], %120 {strides = array<i32>} : memref<8x2xf32, #tpu.memory_space<vmem>>, vector<8x2xf32>,
    return
  }
  func.func @transform_0(%arg0: i32) -> (i32, i32, i32) {
    %c0_i32 = arith.constant 0 : i32
    %c0_i32_0 = arith.constant 0 : i32
    %c0_i32_1 = arith.constant 0 : i32
    return %arg0, %c0_i32, %c0_i32_0 : i32, i32, i32
  }
  func.func @transform_1(%arg0: i32) -> (i32, i32) {
    %c0_i32 = arith.constant 0 : i32
    %c0_i32_0 = arith.constant 0 : i32
    return %arg0, %c0_i32 : i32, i32
  }
  func.func @transform_2(%arg0: i32) -> (i32, i32, i32) {
    %c0_i32 = arith.constant 0 : i32
    %c0_i32_0 = arith.constant 0 : i32
    %c0_i32_1 = arith.constant 0 : i32
    %c0_i32_2 = arith.constant 0 : i32
    return %c0_i32, %c0_i32_0, %c0_i32_1 : i32, i32, i32
  }
  func.func @transform_3(%arg0: i32) -> (i32, i32) {
    %c0_i32 = arith.constant 0 : i32
    %c0_i32_0 = arith.constant 0 : i32
    %c0_i32_1 = arith.constant 0 : i32
    return %c0_i32, %c0_i32_0 : i32, i32
  }
  func.func @transform_4(%arg0: i32) -> (i32, i32) {
    %c0_i32 = arith.constant 0 : i32
    %c0_i32_0 = arith.constant 0 : i32
    %c0_i32_1 = arith.constant 0 : i32
    return %c0_i32, %c0_i32_0 : i32, i32
  }
  func.func @transform_5(%arg0: i32) -> (i32, i32) {
    %c0_i32 = arith.constant 0 : i32
    %c0_i32_0 = arith.constant 0 : i32
    %c0_i32_1 = arith.constant 0 : i32
    return %c0_i32, %c0_i32_0 : i32, i32
  }
  func.func @transform_6(%arg0: i32) -> (i32, i32) {
    %c0_i32 = arith.constant 0 : i32
    %c0_i32_0 = arith.constant 0 : i32
    %c0_i32_1 = arith.constant 0 : i32
    return %c0_i32, %c0_i32_0 : i32, i32
  }
  func.func @transform_7(%arg0: i32) -> (i32, i32) {
    %c0_i32 = arith.constant 0 : i32
    %c0_i32_0 = arith.constant 0 : i32
    %c0_i32_1 = arith.constant 0 : i32
    return %c0_i32, %c0_i32_0 : i32, i32
  }
  func.func @transform_8(%arg0: i32) -> (i32, i32) {
    %c0_i32 = arith.constant 0 : i32
    %c0_i32_0 = arith.constant 0 : i32
    %c0_i32_1 = arith.constant 0 : i32
    return %c0_i32, %c0_i32_0 : i32, i32
  }
  func.func @transform_9(%arg0: i32) -> (i32, i32) {
    %c0_i32 = arith.constant 0 : i32
    %c0_i32_0 = arith.constant 0 : i32
    return %arg0, %c0_i32 : i32, i32
  }
}

</mosaic_0001>

<bundles_post_ra>
// kernel: tpu_custom_call.1
= control target key start
LH: loop header
LB: loop body
LE: loop exit
PB: predicated region body
PF: predicated region fallthrough
CT: control target
= control target key end

     0   :  { %vm42_vm0 = vcmask 261120   ;;  %v127_v43 = vlaneseq  ;;  %vm137_vm7 = vcmask 1041409   ;;  %vm139_vm8 = vcmask 1042434   ;;  %s1337_s15 = smov 96   ;;  %s1338_s16 = smov 64   ;;  %s1884_s0 = inlined_call_operand.vmem [shape: f32[8,8,32], index: 0, kind: input, shape index: {}]   ;;  %s1885_s2 = inlined_call_operand.vmem [shape: f32[1,1,32], index: 2, kind: input, shape index: {}]   ;;  %s1886_s3 = inlined_call_operand.vmem [shape: bf16[32,352], index: 3, kind: input, shape index: {}]   ;;  %s1887_s5 = inlined_call_operand.vmem [shape: bf16[352,140], index: 5, kind: input, shape index: {}]   ;;  %s1888_s4 = inlined_call_operand.vmem [shape: f32[1,352], index: 4, kind: input, shape index: {}]   ;;  %s1889_s1 = inlined_call_operand.vmem [shape: f32[8,3], index: 1, kind: input, shape index: {}]   ;;  %s1890_s6 = inlined_call_operand.vmem [shape: f32[1,140], index: 6, kind: input, shape index: {}]   ;;  %s1891_s8 = inlined_call_operand.vmem [shape: f32[1,6], index: 8, kind: input, shape index: {}]   ;;  %s1892_s7 = inlined_call_operand.vmem [shape: bf16[32,6], index: 7, kind: input, shape index: {}]   ;;  %s1893_s9 = inlined_call_operand.vmem [shape: f32[8,2], index: 9, kind: output, shape index: {}]  }
   0x1   :  { %v1394_v0 = vld [vmem:[%s1884_s0 + $0x10] sm:$0xff]  ;;  %v1399_v1 = vld [vmem:[%s1884_s0] sm:$0xff]  ;;  %v1404_v2 = vld [vmem:[%s1884_s0 + $0x8] sm:$0xff]  ;;  %vm141_vm10 = vcmask 1043459   ;;  %vm143_vm11 = vcmask 1044484   ;;  %vm145_vm13 = vcmask 1045509  }
   0x2   :  { %v49_v3 = vsel %vm42_vm0, %v1394_v0, 0.0  ;;  %v43_v4 = vsel %vm42_vm0, %v1399_v1, 0.0  ;;  %v1303_v5 = vld [vmem:[%s1885_s2] ss:$0 sm:$0xff]  ;;  %v46_v10 = vsel %vm42_vm0, %v1404_v2, 0.0  ;;  %v1422_v11 = vld [vmem:[%s1884_s0 + $0x18] sm:$0xff] }
   0x3   :  { %50 = vadd.xlane.f32.xlu1 %v49_v3  ;;  %44 = vadd.xlane.f32.xlu0 %v43_v4  ;;  %v72_v6 = vmul.f32 %v1303_v5, %v1404_v2  ;;  %v71_v7 = vmul.f32 %v1303_v5, %v1399_v1  ;;  %v52_v12 = vsel %vm42_vm0, %v1422_v11, 0.0  ;;  %v73_v13 = vmul.f32 %v1303_v5, %v1394_v0  ;;  %v1430_v14 = vld [vmem:[%s1884_s0 + $0x20] sm:$0xff]  ;;  %v1441_v20 = vld [vmem:[%s1884_s0 + $0x28] sm:$0xff]  ;;  %v1449_v23 = vld [vmem:[%s1884_s0 + $0x30] sm:$0xff]  ;;  %s1339_s17 = smov 32  }
   0x4   :  { %v55_v15 = vsel %vm42_vm0, %v1430_v14, 0.0  ;;  %v74_v17 = vmul.f32 %v1303_v5, %v1422_v11  ;;  %v75_v19 = vmul.f32 %v1303_v5, %v1430_v14  ;;  %v58_v22 = vsel %vm42_vm0, %v1441_v20, 0.0  ;;  %v1457_v26 = vld [vmem:[%s1884_s0 + $0x38] sm:$0xff] }
   0x5   :  { %v82_v8 = vsel %vm42_vm0, %v72_v6, 0.0  ;;  %v79_v9 = vsel %vm42_vm0, %v71_v7, 0.0  ;;  %v85_v16 = vsel %vm42_vm0, %v73_v13, 0.0  ;;  %v61_v24 = vsel %vm42_vm0, %v1449_v23, 0.0 }
   0x6   :  { %83 = vadd.xlane.f32.xlu2 %v82_v8  ;;  %v88_v18 = vsel %vm42_vm0, %v74_v17, 0.0  ;;  %v91_v21 = vsel %vm42_vm0, %v75_v19, 0.0  ;;  %v76_v25 = vmul.f32 %v1303_v5, %v1441_v20  ;;  %v77_v28 = vmul.f32 %v1303_v5, %v1449_v23 }
   0x7   :  { %v64_v29 = vsel %vm42_vm0, %v1457_v26, 0.0  ;;  %v78_v31 = vmul.f32 %v1303_v5, %v1457_v26  ;;  %v1466_v46 = vand.u32 127, %v127_v43  ;;  %vm147_vm14 = vcmask 1046534  }
   0x8   :  { %v94_v27 = vsel %vm42_vm0, %v76_v25, 0.0  ;;  %v97_v30 = vsel %vm42_vm0, %v77_v28, 0.0  ;;  %vm149_vm15 = vcmask 1047559  }
   0x9   :  { %v100_v32 = vsel %vm42_vm0, %v78_v31, 0.0 }
   0xb   :  { %80 = vadd.xlane.f32.xlu1 %v79_v9  ;;  %47 = vadd.xlane.f32.xlu0 %v46_v10 }
   0xe   :  { %53 = vadd.xlane.f32.xlu2 %v52_v12 }
  0x13   :  { %56 = vadd.xlane.f32.xlu1 %v55_v15  ;;  %86 = vadd.xlane.f32.xlu0 %v85_v16  ;;  %v1331_v16 = vmov 0  }
  0x14   :  { %1294 = vset.pattern.permute.xlu1 %v1331_v16  ;;  %1293 = vset.pattern.permute.xlu0 %v1331_v16 }
  0x15   :  { %1292 = vset.pattern.permute.xlu2 %v1331_v16 }
  0x16   :  { %89 = vadd.xlane.f32.xlu2 %v88_v18 }
  0x1b   :  { %92 = vadd.xlane.f32.xlu1 %v91_v21  ;;  %59 = vadd.xlane.f32.xlu0 %v58_v22 }
  0x1e   :  { %62 = vadd.xlane.f32.xlu2 %v61_v24 }
  0x23   :  { %95 = vadd.xlane.f32.xlu0 %v94_v27  ;;  %65 = vadd.xlane.f32.xlu1 %v64_v29 }
  0x26   :  { %98 = vadd.xlane.f32.xlu2 %v97_v30 }
  0x2b   :  { %101 = vadd.xlane.f32.xlu0 %v100_v32 }
  0x76   :  { %v51_v33 = vpop.xlane.xlu1 %50  ;;  %v45_v34 = vpop.xlane.xlu0 %44 }
  0x77   :  { %vm103_vm2 = vcmp.eq.f32.partialorder %v45_v34, 0.0  ;;  %vm105_vm3 = vcmp.eq.f32.partialorder %v51_v33, 0.0 }
  0x79   :  { %v84_v35 = vpop.xlane.xlu2 %83 }
  0x7e   :  { %v81_v36 = vpop.xlane.xlu1 %80  ;;  %v48_v37 = vpop.xlane.xlu0 %47 }
  0x7f   :  { %vm104_vm1 = vcmp.eq.f32.partialorder %v48_v37, 0.0  ;;  %v111_v47 = vsel %vm103_vm2, -inf, %v81_v36  ;;  %vm776_vm2 = vcmask 785408  }
  0x80   :  { %v112_v48 = vsel %vm104_vm1, -inf, %v84_v35  ;;  %v129_v52 = vperm.slane %v111_v47, %v1466_v46  ;;  %vm152_vm1 = vcmask 64512  }
  0x81   :  { %v54_v38 = vpop.xlane.xlu2 %53  ;;  %v130_v53 = vperm.slane %v112_v48, %v1466_v46 }
  0x82   :  { %vm106_vm5 = vcmp.eq.f32.partialorder %v54_v38, 0.0 }
  0x83   :  { %v138_v62 = vsel %vm137_vm7, %v130_v53, %v129_v52 }
  0x86   :  { %v87_v39 = vpop.xlane.xlu0 %86  ;;  %v57_v40 = vpop.xlane.xlu1 %56 }
  0x87   :  { %vm107_vm4 = vcmp.eq.f32.partialorder %v57_v40, 0.0  ;;  %v113_v49 = vsel %vm105_vm3, -inf, %v87_v39  ;;  %vm886_vm3 = vcmask 31744  }
  0x88   :  { %v131_v55 = vperm.slane %v113_v49, %v1466_v46 }
  0x89   :  { %v90_v41 = vpop.xlane.xlu2 %89 }
  0x8a   :  { %v114_v51 = vsel %vm106_vm5, -inf, %v90_v41  ;;  %v140_v3 = vsel %vm139_vm8, %v131_v55, %v138_v62 }
  0x8b   :  { %v132_v58 = vperm.slane %v114_v51, %v1466_v46 }
  0x8d   :  { %v142_v5 = vsel %vm141_vm10, %v132_v58, %v140_v3 }
  0x8e   :  { %v60_v42 = vpop.xlane.xlu0 %59  ;;  %v93_v44 = vpop.xlane.xlu1 %92 }
  0x8f   :  { %v1470_v54 = vsel %vm107_vm4, -inf, %v93_v44  ;;  %vm108_vm6 = vcmp.eq.f32.partialorder %v60_v42, 0.0 }
  0x90   :  { %v133_v60 = vperm.slane %v1470_v54, %v1466_v46 }
  0x91   :  { %v63_v45 = vpop.xlane.xlu2 %62 }
  0x92   :  { %vm109_vm9 = vcmp.eq.f32.partialorder %v63_v45, 0.0  ;;  %v144_v7 = vsel %vm143_vm11, %v133_v60, %v142_v5 }
  0x96   :  { %v96_v50 = vpop.xlane.xlu0 %95  ;;  %v66_v57 = vpop.xlane.xlu1 %65 }
  0x97   :  { %v116_v56 = vsel %vm108_vm6, -inf, %v96_v50  ;;  %vm110_vm12 = vcmp.eq.f32.partialorder %v66_v57, 0.0 }
  0x98   :  { %v134_v63 = vperm.slane %v116_v56, %v1466_v46 }
  0x99   :  { %v99_v59 = vpop.xlane.xlu2 %98 }
  0x9a   :  { %v1476_v61 = vsel %vm109_vm9, -inf, %v99_v59  ;;  %v146_v10 = vsel %vm145_vm13, %v134_v63, %v144_v7 }
  0x9b   :  { %v135_v4 = vperm.slane %v1476_v61, %v1466_v46 }
  0x9d   :  { %v148_v12 = vsel %vm147_vm14, %v135_v4, %v146_v10 }
  0x9e   :  { %v102_v6 = vpop.xlane.xlu0 %101 }
  0x9f   :  { %v118_v8 = vsel %vm110_vm12, -inf, %v102_v6 }
  0xa0   :  { %v136_v9 = vperm.slane %v118_v8, %v1466_v46 }
  0xa2   :  { %v150_v13 = vsel %vm149_vm15, %v136_v9, %v148_v12 }
  0xa3   :  { %v153_v15 = vsel %vm152_vm1, %v150_v13, -inf }
  0xa4   :  { %154 = vmax.xlane.f32.xlu1 %v153_v15 }
 0x117   :  { %v155_v17 = vpop.xlane.xlu1 %154 }
 0x118   :  { %v159_v18 = vperm.slane %v155_v17, 2  ;;  %v158_v19 = vperm.slane %v155_v17, 1  ;;  %v157_v21 = vperm.slane %v155_v17, 0  ;;  %v162_v27 = vperm.slane %v155_v17, 5 }
 0x119   :  { %v160_v28 = vperm.slane %v155_v17, 3  ;;  %v164_v35 = vperm.slane %v155_v17, 7  ;;  %v161_v38 = vperm.slane %v155_v17, 4 }
 0x11a   :  { %v175_v22 = vsub.f32 %v113_v49, %v159_v18  ;;  %v174_v24 = vsub.f32 %v112_v48, %v158_v19  ;;  %v173_v25 = vsub.f32 %v111_v47, %v157_v21  ;;  %v178_v32 = vsub.f32 %v116_v56, %v162_v27 }
 0x11b   :  { %v176_v33 = vsub.f32 %v114_v51, %v160_v28  ;;  %v180_v41 = vsub.f32 %v118_v8, %v164_v35  ;;  %v177_v42 = vsub.f32 %v1470_v54, %v161_v38  ;;  %v163_v47 = vperm.slane %v155_v17, 6 }
 0x11c   :  { %v185_v29 = vmul.f32 1.442695, %v175_v22  ;;  %v183_v30 = vmul.f32 1.442695, %v174_v24  ;;  %v181_v31 = vmul.f32 1.442695, %v173_v25 }
 0x11d   :  { %v191_v34 = vmul.f32 1.442695, %v178_v32  ;;  %v187_v37 = vmul.f32 1.442695, %v176_v33  ;;  %v195_v43 = vmul.f32 1.442695, %v180_v41  ;;  %v179_v49 = vsub.f32 %v1476_v61, %v163_v47 }
 0x11e   :  { %1305 = vpow2.f32 %v185_v29  ;;  %v189_v45 = vmul.f32 1.442695, %v177_v42 }
 0x11f   :  { %1307 = vpow2.f32 %v183_v30  ;;  %v193_v51 = vmul.f32 1.442695, %v179_v49 }
 0x120   :  { %1309 = vpow2.f32 %v181_v31 }
 0x121   :  { %1311 = vpow2.f32 %v191_v34 }
 0x122   :  { %1313 = vpow2.f32 %v187_v37 }
 0x123   :  { %1315 = vpow2.f32 %v195_v43 }
 0x124   :  { %v1493_v36 = vpop.eup %1305  ;;  %1317 = vpow2.f32 %v189_v45 }
 0x125   :  { %v1308_v39 = vpop.eup %1307  ;;  %212 = vperm.xlu1 %1294, %v1493_v36   ;;  %1319 = vpow2.f32 %v193_v51 }
 0x126   :  { %v1310_v40 = vpop.eup %1309  ;;  %209 = vperm.xlu0 %1293, %v1308_v39  }
 0x127   :  { %206 = vperm.xlu2 %1292, %v1310_v40   ;;  %v1312_v44 = vpop.eup %1311 }
 0x128   :  { %v1314_v48 = vpop.eup %1313 }
 0x129   :  { %v1316_v50 = vpop.eup %1315 }
 0x12a   :  { %v1318_v52 = vpop.eup %1317 }
 0x12b   :  { %v1320_v53 = vpop.eup %1319 }
 0x12d   :  { %221 = vperm.xlu1 %1294, %v1312_v44  }
 0x12f   :  { %215 = vperm.xlu2 %1292, %v1314_v48  }
 0x135   :  { %227 = vperm.xlu1 %1294, %v1316_v50  }
 0x137   :  { %218 = vperm.xlu2 %1292, %v1318_v52  }
 0x13f   :  { %224 = vperm.xlu2 %1292, %v1320_v53  }
 0x181   :  { %v207_v54 = vpop.permute.xlu2 %206 }
 0x182   :  { %v229_v59 = vperm.slane %v207_v54, %v1466_v46 }
 0x189   :  { %v216_v55 = vpop.permute.xlu2 %215 }
 0x18a   :  { %v232_v4 = vperm.slane %v216_v55, %v1466_v46 }
 0x191   :  { %v219_v60 = vpop.permute.xlu2 %218 }
 0x192   :  { %v233_v7 = vperm.slane %v219_v60, %v1466_v46 }
 0x197   :  { %v213_v56 = vpop.permute.xlu1 %212 }
 0x198   :  { %v210_v57 = vpop.permute.xlu0 %209  ;;  %v231_v62 = vperm.slane %v213_v56, %v1466_v46 }
 0x199   :  { %v230_v58 = vperm.slane %v210_v57, %v1466_v46  ;;  %v225_v8 = vpop.permute.xlu2 %224 }
 0x19a   :  { %v235_v12 = vperm.slane %v225_v8, %v1466_v46 }
 0x19b   :  { %v237_v61 = vsel %vm137_vm7, %v230_v58, %v229_v59 }
 0x19c   :  { %v238_v63 = vsel %vm139_vm8, %v231_v62, %v237_v61 }
 0x19d   :  { %v239_v6 = vsel %vm141_vm10, %v232_v4, %v238_v63  ;;  %v1030_v63 = vld [vmem:[%s1886_s3 + $0x18] sm:$0xf] }
 0x19e   :  { %v240_v9 = vsel %vm143_vm11, %v233_v7, %v239_v6  ;;  %v1018_v7 = vld [vmem:[%s1886_s3] sm:$0xf] }
 0x19f   :  { %v222_v3 = vpop.permute.xlu1 %221 }
 0x1a0   :  { %v234_v5 = vperm.slane %v222_v3, %v1466_v46  ;;  %v1233_v3 = vld [vmem:[%s1886_s3 + $0x1c] sm:$0xf] }
 0x1a2   :  { %v241_v10 = vsel %vm145_vm13, %v234_v5, %v240_v9 }
 0x1a3   :  { %v242_v17 = vsel %vm147_vm14, %v235_v12, %v241_v10  ;;  %v1231_v12 = vld [vmem:[%s1886_s3 + $0x8] sm:$0xf0] }
 0x1a7   :  { %v228_v13 = vpop.permute.xlu1 %227 }
 0x1a8   :  { %v236_v15 = vperm.slane %v228_v13, %v1466_v46 }
 0x1aa   :  { %v243_v18 = vsel %vm149_vm15, %v236_v15, %v242_v17 }
 0x1ab   :  { %v245_v19 = vsel %vm152_vm1, %v243_v18, 0.0  ;;  %v1019_v18 = vor.u32 %v1231_v12, %v1018_v7 }
 0x1ac   :  { %246 = vadd.xlane.f32.xlu0 %v245_v19  ;;  %v1230_v19 = vld [vmem:[%s1886_s3 + $0x4] sm:$0xf] }
 0x21f   :  { %v247_v21 = vpop.xlane.xlu0 %246 }
 0x220   :  { %1321 = vrcp.f32 %v247_v21  ;;  %v1020_v21 = vld [vmem:[%s1886_s3 + $0xc] sm:$0xf0] }
 0x226   :  { %v1322_v22 = vpop.eup %1321 }
 0x227   :  { %v251_v24 = vperm.slane %v1322_v22, 1  ;;  %v250_v25 = vperm.slane %v1322_v22, 0  ;;  %v253_v29 = vperm.slane %v1322_v22, 3  ;;  %v252_v30 = vperm.slane %v1322_v22, 2 }
 0x228   :  { %v255_v32 = vperm.slane %v1322_v22, 5  ;;  %v254_v33 = vperm.slane %v1322_v22, 4  ;;  %v257_v37 = vperm.slane %v1322_v22, 7  ;;  %v256_v38 = vperm.slane %v1322_v22, 6 }
 0x229   :  { %v267_v27 = vmul.f32 %v1308_v39, %v251_v24  ;;  %v266_v28 = vmul.f32 %v1310_v40, %v250_v25  ;;  %v269_v31 = vmul.f32 %v1314_v48, %v253_v29  ;;  %v268_v46 = vmul.f32 %v1493_v36, %v252_v30 }
 0x22a   :  { %v271_v34 = vmul.f32 %v1312_v44, %v255_v32  ;;  %v270_v35 = vmul.f32 %v1318_v52, %v254_v33  ;;  %v273_v41 = vmul.f32 %v1316_v50, %v257_v37  ;;  %v272_v39 = vmul.f32 %v1320_v53, %v256_v38  ;;  %v1026_v32 = vld [vmem:[%s1886_s3 + $0x8] sm:$0xf]  ;;  %v1232_v33 = vld [vmem:[%s1886_s3 + $0x10] sm:$0xf0] }
 0x22b   :  { %281 = vperm.xlu1 %1294, %v267_v27   ;;  %276 = vperm.xlu2 %1292, %v266_v28   ;;  %v1023_v24 = vor.u32 %v1230_v19, %v1020_v21  ;;  %v1038_v27 = vld [vmem:[%s1886_s3 + $0x20] sm:$0xf]  ;;  %v1235_v28 = vld [vmem:[%s1886_s3 + $0x28] sm:$0xf0]  ;;  %v1165_v19 = vld [vmem:[%s1887_s5 + $0xf0] sm:$0xf] }
 0x22c   :  { %v1267_v21 = vld [vmem:[%s1887_s5 + $0xf4] sm:$0xf0] }
 0x233   :  { %291 = vperm.xlu1 %1294, %v269_v31   ;;  %286 = vperm.xlu2 %1292, %v268_v46   ;;  %v1039_v46 = vor.u32 %v1235_v28, %v1038_v27  ;;  %v1247_v27 = vld [vmem:[%s1887_s5 + $0x54] sm:$0xf0] }
 0x23b   :  { %301 = vperm.xlu1 %1294, %v271_v34   ;;  %296 = vperm.xlu2 %1292, %v270_v35  }
 0x243   :  { %311 = vperm.xlu1 %1294, %v273_v41   ;;  %306 = vperm.xlu2 %1292, %v272_v39  }
 0x285   :  { %v277_v40 = vpop.permute.xlu2 %276 }
 0x286   :  { %v314_v45 = vmul.f32 %v277_v40, %v1399_v1 }
 0x288   :  { %v322_v36 = vsel %vm42_vm0, %v314_v45, 0.0 }
 0x289   :  { %v323_v48 = vrot.slane %v322_v36, 4 }
 0x28b   :  { %v324_v54 = vadd.f32 %v323_v48, %v322_v36 }
 0x28d   :  { %v287_v42 = vpop.permute.xlu2 %286 }
 0x28e   :  { %v316_v47 = vmul.f32 %v287_v42, %v1394_v0  ;;  %v325_v0 = vrot.slane %v324_v54, 2  ;;  %v1027_v42 = vor.u32 %v1232_v33, %v1026_v32 }
 0x290   :  { %v336_v51 = vsel %vm42_vm0, %v316_v47, 0.0  ;;  %v326_v8 = vadd.f32 %v325_v0, %v324_v54 }
 0x291   :  { %v337_v56 = vrot.slane %v336_v51, 4 }
 0x292   :  { %v327_v29 = vrot.slane %v326_v8, 1 }
 0x293   :  { %v338_v62 = vadd.f32 %v337_v56, %v336_v51 }
 0x295   :  { %v297_v43 = vpop.permute.xlu2 %296  ;;  %v339_v13 = vrot.slane %v338_v62, 2 }
 0x296   :  { %v318_v50 = vmul.f32 %v297_v43, %v1430_v14  ;;  %v328_v43 = vadd.f32 %v327_v29, %v326_v8 }
 0x297   :  { %v340_v34 = vadd.f32 %v339_v13, %v338_v62 }
 0x298   :  { %v350_v57 = vsel %vm42_vm0, %v318_v50, 0.0  ;;  %v378_v50 = vpack.c.bf16 %v328_v43, %v328_v43 }
 0x299   :  { %v341_v47 = vrot.slane %v340_v34, 1 }
 0x29b   :  { %v342_v54 = vadd.f32 %v341_v47, %v340_v34  ;;  %v1279_v47 = vld [vmem:[%s1887_s5 + $0x154] sm:$0xf0] }
 0x29d   :  { %v282_v44 = vpop.permute.xlu1 %281  ;;  %v307_v52 = vpop.permute.xlu2 %306 }
 0x29e   :  { %v315_v49 = vmul.f32 %v282_v44, %v1404_v2  ;;  %v320_v1 = vmul.f32 %v307_v52, %v1449_v23  ;;  %v351_v2 = vrot.slane %v350_v57, 4  ;;  %v1234_v23 = vld [vmem:[%s1886_s3 + $0x20] sm:$0xf0] }
 0x29f   :  { %v1031_v6 = vor.u32 %v1234_v23, %v1030_v63 }
 0x2a0   :  { %v329_v53 = vsel %vm42_vm0, %v315_v49, 0.0  ;;  %v364_v61 = vsel %vm42_vm0, %v320_v1, 0.0  ;;  %v352_v15 = vadd.f32 %v351_v2, %v350_v57  ;;  %v410_v2 = vunpack.c.l.b16 %v378_v50 }
 0x2a1   :  { %v330_v55 = vrot.slane %v329_v53, 4  ;;  %v365_v17 = vrot.slane %v364_v61, 4  ;;  %467 = vmatpush.bf16.msra.mxu0 %v1031_v6 }
 0x2a2   :  { %v353_v35 = vrot.slane %v352_v15, 2 }
 0x2a3   :  { %v331_v58 = vadd.f32 %v330_v55, %v329_v53  ;;  %v366_v37 = vadd.f32 %v365_v17, %v364_v61  ;;  %v380_v61 = vpack.c.bf16 %v342_v54, %v342_v54  ;;  %v1141_v54 = vld [vmem:[%s1887_s5 + $0xc0] sm:$0xf] }
 0x2a4   :  { %v354_v48 = vadd.f32 %v353_v35, %v352_v15  ;;  %v1249_v15 = vld [vmem:[%s1887_s5 + $0x64] sm:$0xf0] }
 0x2a5   :  { %v332_v59 = vrot.slane %v331_v58, 2  ;;  %v292_v60 = vpop.permute.xlu1 %291  ;;  %468 = vmatpush.bf16.msra.mxu0 %v1019_v18  ;;  %v367_v44 = vrot.slane %v366_v37, 2 }
 0x2a6   :  { %v317_v14 = vmul.f32 %v292_v60, %v1422_v11  ;;  %v1032_v11 = vld [vmem:[%s1886_s3 + $0x24] sm:$0xf0]  ;;  %v355_v55 = vrot.slane %v354_v48, 1 }
 0x2a7   :  { %v333_v4 = vadd.f32 %v332_v59, %v331_v58  ;;  %v1035_v10 = vor.u32 %v1233_v3, %v1032_v11  ;;  %v368_v56 = vadd.f32 %v367_v44, %v366_v37  ;;  %v1250_v44 = vld [vmem:[%s1887_s5 + $0x74] sm:$0xf] }
 0x2a8   :  { %v343_v5 = vsel %vm42_vm0, %v317_v14, 0.0  ;;  %v356_v14 = vadd.f32 %v355_v55, %v354_v48  ;;  %v1261_v55 = vld [vmem:[%s1887_s5 + $0xc4] sm:$0xf0] }
 0x2a9   :  { %v344_v9 = vrot.slane %v343_v5, 4  ;;  %480 = vmatpush.bf16.msra.mxu2 %v1035_v10  ;;  %v334_v25 = vrot.slane %v333_v4, 1  ;;  %v369_v63 = vrot.slane %v368_v56, 1  ;;  %v412_v10 = vunpack.c.l.b16 %v380_v61  ;;  %v1095_v61 = vld [vmem:[%s1887_s5 + $0x68] sm:$0xf0] }
 0x2aa   :  { %v382_v12 = vpack.c.bf16 %v356_v14, %v356_v14  ;;  %v1142_v14 = vor.u32 %v1261_v55, %v1141_v54  ;;  %v1109_v54 = vld [vmem:[%s1887_s5 + $0x80] sm:$0xf]  ;;  %v1253_v55 = vld [vmem:[%s1887_s5 + $0x84] sm:$0xf0] }
 0x2ab   :  { %v345_v22 = vadd.f32 %v344_v9, %v343_v5  ;;  %v335_v39 = vadd.f32 %v334_v25, %v333_v4  ;;  %v1101_v5 = vld [vmem:[%s1887_s5 + $0x70] sm:$0xf]  ;;  %v1093_v9 = vld [vmem:[%s1887_s5 + $0x60] sm:$0xf]  ;;  %v370_v13 = vadd.f32 %v369_v63, %v368_v56 }
 0x2ac   :  { %v1094_v18 = vor.u32 %v1249_v15, %v1093_v9  ;;  %v1085_v25 = vld [vmem:[%s1887_s5 + $0x50] sm:$0xf]  ;;  %v414_v32 = vunpack.c.l.b16 %v382_v12  ;;  %v1079_v12 = vld [vmem:[%s1887_s5 + $0x48] sm:$0xf0]  ;;  %v1242_v15 = vld [vmem:[%s1887_s5 + $0x34] sm:$0xf] }
 0x2ad   :  { %v346_v30 = vrot.slane %v345_v22, 2  ;;  %v302_v31 = vpop.permute.xlu1 %301  ;;  %481 = vmatpush.bf16.msra.mxu2 %v1023_v24  ;;  %v379_v51 = vpack.c.bf16 %v335_v39, %v335_v39  ;;  %v1166_v24 = vor.u32 %v1267_v21, %v1165_v19  ;;  %v384_v33 = vpack.c.bf16 %v370_v13, %v370_v13  ;;  %v1240_v19 = vld [vmem:[%s1887_s5 + $0x24] sm:$0xf]  ;;  %v1063_v21 = vld [vmem:[%s1887_s5 + $0x28] sm:$0xf0] }
 0x2ae   :  { %v319_v38 = vmul.f32 %v302_v31, %v1441_v20  ;;  %v1157_v31 = vld [vmem:[%s1887_s5 + $0xe0] sm:$0xf]  ;;  %v1086_v37 = vor.u32 %v1247_v27, %v1085_v25  ;;  %v1239_v25 = vld [vmem:[%s1887_s5 + $0x14] sm:$0xf0]  ;;  %v1238_v27 = vld [vmem:[%s1887_s5 + $0x14] sm:$0xf] }
 0x2af   :  { %v347_v41 = vadd.f32 %v346_v30, %v345_v22  ;;  %v411_v58 = vunpack.c.l.b16 %v379_v51  ;;  %793 = vmatpush.bf16.msrb.mxu0 %v1166_v24  ;;  %v416_v48 = vunpack.c.l.b16 %v384_v33  ;;  %v1053_v24 = vld [vmem:[%s1887_s5 + $0x10] sm:$0xf]  ;;  %v1125_v33 = vld [vmem:[%s1887_s5 + $0xa0] sm:$0xf] }
 0x2b0   :  { %v357_v40 = vsel %vm42_vm0, %v319_v38, 0.0  ;;  %v1149_v38 = vld [vmem:[%s1887_s5 + $0xd0] sm:$0xf] }
 0x2b1   :  { %493 = vmatpush.bf16.msrb.mxu2 %v1039_v46  ;;  %v348_v45 = vrot.slane %v347_v41, 1  ;;  %v358_v36 = vrot.slane %v357_v40, 4  ;;  %v418_v4 = vsel %vm137_vm7, %v411_v58, %v410_v2  ;;  %v1265_v46 = vld [vmem:[%s1887_s5 + $0xe4] sm:$0xf0]  ;;  %v1248_v2 = vld [vmem:[%s1887_s5 + $0x64] sm:$0xf] }
 0x2b2   :  { %v419_v22 = vsel %vm139_vm8, %v412_v10, %v418_v4  ;;  %v1158_v34 = vor.u32 %v1265_v46, %v1157_v31  ;;  %v1277_v58 = vld [vmem:[%s1887_s5 + $0x144] sm:$0xf0]  ;;  %v1061_v4 = vld [vmem:[%s1887_s5 + $0x20] sm:$0xf]  ;;  %v1244_v10 = vld [vmem:[%s1887_s5 + $0x44] sm:$0xf] }
 0x2b3   :  { %v359_v49 = vadd.f32 %v358_v36, %v357_v40  ;;  %v349_v52 = vadd.f32 %v348_v45, %v347_v41  ;;  %v1263_v41 = vld [vmem:[%s1887_s5 + $0xd4] sm:$0xf0]  ;;  %v1077_v40 = vld [vmem:[%s1887_s5 + $0x40] sm:$0xf]  ;;  %v1213_v36 = vld [vmem:[%s1887_s5 + $0x150] sm:$0xf]  ;;  %v1082_v13 = vor.u32 %v1244_v10, %v1079_v12 }
 0x2b4   :  { %794 = vmatpush.bf16.msrb.mxu0 %v1158_v34  ;;  %v1150_v51 = vor.u32 %v1263_v41, %v1149_v38  ;;  %v1214_v50 = vor.u32 %v1279_v47, %v1213_v36  ;;  %v1275_v31 = vld [vmem:[%s1887_s5 + $0x134] sm:$0xf0]  ;;  %v1257_v34 = vld [vmem:[%s1887_s5 + $0xa4] sm:$0xf0]  ;;  %v1236_v41 = vld [vmem:[%s1887_s5 + $0x4] sm:$0xf] }
 0x2b5   :  { %494 = vmatpush.bf16.msrb.mxu2 %v1027_v42  ;;  %v360_v20 = vrot.slane %v359_v49, 2  ;;  %v312_v53 = vpop.permute.xlu1 %311  ;;  %v381_v59 = vpack.c.bf16 %v349_v52, %v349_v52  ;;  %v1245_v42 = vld [vmem:[%s1887_s5 + $0x44] sm:$0xf0]  ;;  %v1117_v47 = vld [vmem:[%s1887_s5 + $0x90] sm:$0xf] }
 0x2b6   :  { %v321_v1 = vmul.f32 %v312_v53, %v1457_v26  ;;  %v1251_v26 = vld [vmem:[%s1887_s5 + $0x74] sm:$0xf0]  ;;  %v1069_v53 = vld [vmem:[%s1887_s5 + $0x30] sm:$0xf]  ;;  %808 = vmatpush.bf16.msra.mxu1 %v1214_v50  ;;  %v1237_v38 = vld [vmem:[%s1887_s5 + $0x4] sm:$0xf0] }
 0x2b7   :  { %v361_v57 = vadd.f32 %v360_v20, %v359_v49  ;;  %v413_v6 = vunpack.c.l.b16 %v381_v59  ;;  %v1102_v8 = vor.u32 %v1251_v26, %v1101_v5  ;;  %v1103_v49 = vld [vmem:[%s1887_s5 + $0x78] sm:$0xf0]  ;;  %v1078_v20 = vor.u32 %v1245_v42, %v1077_v40  ;;  %v1241_v5 = vld [vmem:[%s1887_s5 + $0x24] sm:$0xf0]  ;;  %v1181_v50 = vld [vmem:[%s1887_s5 + $0x110] sm:$0xf] }
 0x2b8   :  { %v371_v0 = vsel %vm42_vm0, %v321_v1, 0.0  ;;  %v1243_v1 = vld [vmem:[%s1887_s5 + $0x34] sm:$0xf0]  ;;  %v1106_v59 = vor.u32 %v1250_v44, %v1103_v49  ;;  %795 = vmatpush.bf16.msrb.mxu0 %v1150_v51  ;;  %v1098_v26 = vor.u32 %v1248_v2, %v1095_v61  ;;  %v1278_v44 = vld [vmem:[%s1887_s5 + $0x154] sm:$0xf] }
 0x2b9   :  { %v362_v60 = vrot.slane %v361_v57, 1  ;;  %v372_v62 = vrot.slane %v371_v0, 4  ;;  %780 = vmatpush.bf16.msra.mxu3 %v1102_v8  ;;  %v420_v28 = vsel %vm141_vm10, %v413_v6, %v419_v22  ;;  %v1070_v63 = vor.u32 %v1243_v1, %v1069_v53  ;;  %v1246_v6 = vld [vmem:[%s1887_s5 + $0x54] sm:$0xf]  ;;  %v1215_v51 = vld [vmem:[%s1887_s5 + $0x158] sm:$0xf0] }
 0x2ba   :  { %v421_v39 = vsel %vm143_vm11, %v414_v32, %v420_v28  ;;  %v1062_v8 = vor.u32 %v1241_v5, %v1061_v4  ;;  %v1066_v22 = vor.u32 %v1240_v19, %v1063_v21  ;;  %v1054_v28 = vor.u32 %v1239_v25, %v1053_v24  ;;  %v1274_v61 = vld [vmem:[%s1887_s5 + $0x134] sm:$0xf]  ;;  %v1272_v5 = vld [vmem:[%s1887_s5 + $0x124] sm:$0xf]  ;;  %v1175_v21 = vld [vmem:[%s1887_s5 + $0x108] sm:$0xf0] }
 0x2bb   :  { %v363_v23 = vadd.f32 %v362_v60, %v361_v57  ;;  %v373_v3 = vadd.f32 %v372_v62, %v371_v0  ;;  %v1205_v57 = vld [vmem:[%s1887_s5 + $0x140] sm:$0xf]  ;;  %v1110_v1 = vor.u32 %v1253_v55, %v1109_v54  ;;  %v1270_v10 = vld [vmem:[%s1887_s5 + $0x114] sm:$0xf]  ;;  %v1268_v19 = vld [vmem:[%s1887_s5 + $0x104] sm:$0xf] }
 0x2bc   :  { %v1206_v60 = vor.u32 %v1277_v58, %v1205_v57  ;;  %796 = vmatpush.bf16.msrb.mxu0 %v1142_v14  ;;  %v1207_v57 = vld [vmem:[%s1887_s5 + $0x148] sm:$0xf0]  ;;  %v1173_v58 = vld [vmem:[%s1887_s5 + $0x100] sm:$0xf]  ;;  %v1199_v14 = vld [vmem:[%s1887_s5 + $0x138] sm:$0xf0]  ;;  %v1178_v25 = vor.u32 %v1268_v19, %v1175_v21 }
 0x2bd   :  { %v383_v11 = vpack.c.bf16 %v363_v23, %v363_v23  ;;  %v374_v7 = vrot.slane %v373_v3, 2  ;;  %781 = vmatpush.bf16.msra.mxu3 %v1094_v18  ;;  %v1133_v23 = vld [vmem:[%s1887_s5 + $0xb0] sm:$0xf]  ;;  %v1202_v4 = vor.u32 %v1274_v61, %v1199_v14 }
 0x2be   :  { %809 = vmatpush.bf16.msra.mxu1 %v1206_v60  ;;  %v1266_v60 = vld [vmem:[%s1887_s5 + $0xf4] sm:$0xf] }
 0x2bf   :  { %v375_v17 = vadd.f32 %v374_v7, %v373_v3  ;;  %v415_v29 = vunpack.c.l.b16 %v383_v11  ;;  %v1259_v3 = vld [vmem:[%s1887_s5 + $0xb4] sm:$0xf0]  ;;  %v1087_v11 = vld [vmem:[%s1887_s5 + $0x58] sm:$0xf0] }
 0x2c0   :  { %v1134_v7 = vor.u32 %v1259_v3, %v1133_v23  ;;  %v1090_v9 = vor.u32 %v1246_v6, %v1087_v11  ;;  %v1264_v23 = vld [vmem:[%s1887_s5 + $0xe4] sm:$0xf]  ;;  %v1159_v3 = vld [vmem:[%s1887_s5 + $0xe8] sm:$0xf0] }
 0x2c1   :  { %v376_v30 = vrot.slane %v375_v17, 1  ;;  %v422_v45 = vsel %vm145_vm13, %v415_v29, %v421_v39  ;;  %782 = vmatpush.bf16.msra.mxu3 %v1086_v37  ;;  %v1055_v29 = vld [vmem:[%s1887_s5 + $0x18] sm:$0xf0]  ;;  %v1126_v37 = vor.u32 %v1257_v34, %v1125_v33  ;;  %v1047_v39 = vld [vmem:[%s1887_s5 + $0x8] sm:$0xf0]  ;;  %v1162_v6 = vor.u32 %v1264_v23, %v1159_v3 }
 0x2c2   :  { %v423_v56 = vsel %vm147_vm14, %v416_v48, %v422_v45  ;;  %797 = vmatpush.bf16.msrb.mxu0 %v1134_v7  ;;  %v1058_v46 = vor.u32 %v1238_v27, %v1055_v29  ;;  %v1050_v42 = vor.u32 %v1236_v41, %v1047_v39  ;;  %v1273_v45 = vld [vmem:[%s1887_s5 + $0x124] sm:$0xf0]  ;;  %v1255_v48 = vld [vmem:[%s1887_s5 + $0x94] sm:$0xf0]  ;;  %v394_v7 = vld [vmem:[%s1888_s4] sm:$0x7] }
 0x2c3   :  { %v377_v35 = vadd.f32 %v376_v30, %v375_v17  ;;  %v1071_v17 = vld [vmem:[%s1887_s5 + $0x38] sm:$0xf0]  ;;  %v1197_v30 = vld [vmem:[%s1887_s5 + $0x130] sm:$0xf]  ;;  %v1118_v49 = vor.u32 %v1255_v48, %v1117_v47  ;;  %v1258_v27 = vld [vmem:[%s1887_s5 + $0xb4] sm:$0xf] }
 0x2c4   :  { %v1074_v18 = vor.u32 %v1242_v15, %v1071_v17  ;;  %v1198_v32 = vor.u32 %v1275_v31, %v1197_v30  ;;  %v1260_v15 = vld [vmem:[%s1887_s5 + $0xc4] sm:$0xf]  ;;  %v1143_v17 = vld [vmem:[%s1887_s5 + $0xc8] sm:$0xf0]  ;;  %v397_v34 = vperm.slane %v394_v7, 1  ;;  %s1335_s4 = smov 124  }
 0x2c5   :  { %v385_v43 = vpack.c.bf16 %v377_v35, %v377_v35  ;;  %783 = vmatpush.bf16.msra.mxu3 %v1078_v20  ;;  %v1045_v35 = vld [vmem:[%s1887_s5] sm:$0xf]  ;;  %v1218_v20 = vor.u32 %v1278_v44, %v1215_v51  ;;  %v1146_v24 = vor.u32 %v1260_v15, %v1143_v17  ;;  %v1254_v41 = vld [vmem:[%s1887_s5 + $0x94] sm:$0xf]  ;;  %v1119_v39 = vld [vmem:[%s1887_s5 + $0x98] sm:$0xf0] }
 0x2c6   :  { %810 = vmatpush.bf16.msra.mxu1 %v1198_v32  ;;  %v1046_v40 = vor.u32 %v1237_v38, %v1045_v35  ;;  %798 = vmatpush.bf16.msrb.mxu0 %v1126_v37  ;;  %v1127_v32 = vld [vmem:[%s1887_s5 + $0xa8] sm:$0xf0] }
 0x2c7   :  { %v417_v52 = vunpack.c.l.b16 %v385_v43  ;;  %v1189_v43 = vld [vmem:[%s1887_s5 + $0x120] sm:$0xf]  ;;  %v1111_v47 = vld [vmem:[%s1887_s5 + $0x88] sm:$0xf0] }
 0x2c8   :  { %v1190_v36 = vor.u32 %v1273_v45, %v1189_v43  ;;  %v1122_v45 = vor.u32 %v1254_v41, %v1119_v39 }
 0x2c9   :  { %v424_v0 = vsel %vm149_vm15, %v417_v52, %v423_v56  ;;  %784 = vmatpush.bf16.msra.mxu3 %v1070_v63  ;;  %v1271_v52 = vld [vmem:[%s1887_s5 + $0x114] sm:$0xf0]  ;;  %v1276_v56 = vld [vmem:[%s1887_s5 + $0x144] sm:$0xf] }
 0x2ca   :  { %v425_v62 = vpack.c.b16 %v424_v0, %v424_v0  ;;  %811 = vmatpush.bf16.msra.mxu1 %v1190_v36  ;;  %v1182_v53 = vor.u32 %v1271_v52, %v1181_v50  ;;  %799 = vmatpush.bf16.msrb.mxu0 %v1118_v49  ;;  %v1269_v0 = vld [vmem:[%s1887_s5 + $0x104] sm:$0xf0]  ;;  %v1252_v36 = vld [vmem:[%s1887_s5 + $0x84] sm:$0xf]  ;;  %v1332_v50 = vmov 2   ;;  %v1333_v52 = vmov 1  }
 0x2cb   :  { %v1174_v2 = vor.u32 %v1269_v0, %v1173_v58  ;;  %v1114_v44 = vor.u32 %v1252_v36, %v1111_v47  ;;  %v41_v49 = vld [vmem:[%s1889_s1] sm:$0xff]  ;;  %1296 = vset.pattern.permute.xlu1 %v1332_v50  ;;  %1295 = vset.pattern.permute.xlu2 %v1333_v52 }
 0x2cc   :  { %1040 = vmatmul.msk.bf16.vlgmr.msra.gmra.mxu0 %vm42_vm0, %v425_v62  ;;  %1041 = vmatmul.msk.bf16.vlgmr.msra.gmra.mxu2 %vm42_vm0, %v425_v62 }
 0x2cd   :  { %819 = vmatpush.bf16.msra.mxu2 %v1106_v59  ;;  %785 = vmatpush.bf16.msra.mxu3 %v1062_v8  ;;  %v1210_v59 = vor.u32 %v1276_v56, %v1207_v57  ;;  %v1262_v8 = vld [vmem:[%s1887_s5 + $0xd4] sm:$0xf]  ;;  %v550_v57 = vld [vmem:[%s1890_s6] sm:$0x3]  ;;  %s1334_s6 = smov 120  }
 0x2ce   :  { %812 = vmatpush.bf16.msra.mxu1 %v1182_v53  ;;  %800 = vmatpush.bf16.msrb.mxu0 %v1110_v1  ;;  %v552_v58 = vperm.slane %v550_v57, 0 }
 0x2cf   :  { %877 = vperm.xlu1 %1296, %v41_v49   ;;  %867 = vperm.xlu2 %1295, %v41_v49  }
 0x2d0   :  { %1298 = vset.pattern.permute.xlu0 %v1333_v52 }
 0x2d1   :  { %820 = vmatpush.bf16.msra.mxu2 %v1098_v26  ;;  %786 = vmatpush.bf16.msra.mxu3 %v1054_v28  ;;  %v1191_v26 = vld [vmem:[%s1887_s5 + $0x128] sm:$0xf0]  ;;  %v1135_v28 = vld [vmem:[%s1887_s5 + $0xb8] sm:$0xf0] }
 0x2d2   :  { %813 = vmatpush.bf16.msra.mxu1 %v1174_v2  ;;  %v1194_v11 = vor.u32 %v1272_v5, %v1191_v26  ;;  %v1138_v31 = vor.u32 %v1258_v27, %v1135_v28  ;;  %v553_v5 = vperm.slane %v550_v57, 1 }
 0x2d5   :  { %821 = vmatpush.bf16.msra.mxu2 %v1090_v9  ;;  %787 = vmatpush.bf16.msra.mxu3 %v1046_v40  ;;  %v1151_v9 = vld [vmem:[%s1887_s5 + $0xd8] sm:$0xf0] }
 0x2d6   :  { %v1154_v12 = vor.u32 %v1262_v8, %v1151_v9 }
 0x2d7   :  { %1297 = vset.pattern.permute.xlu2 %v1331_v16  ;;  %1301 = vset.pattern.permute.xlu1 %v1331_v16 }
 0x2d8   :  { %861 = vperm.xlu2 %1297, %v41_v49  }
 0x2d9   :  { %822 = vmatpush.bf16.msra.mxu2 %v1082_v13  ;;  %847 = vmatpush.bf16.msrb.mxu3 %v1218_v20  ;;  %v1183_v13 = vld [vmem:[%s1887_s5 + $0x118] sm:$0xf0]  ;;  %v398_v20 = vperm.slane %v394_v7, 2 }
 0x2dc   :  { %1042 = vmatmul.msk.bf16.vlgmr.msrb.gmra.mxu2 %vm42_vm0, %v425_v62  ;;  %v1167_v62 = vld [vmem:[%s1887_s5 + $0xf8] sm:$0xf0] }
 0x2dd   :  { %823 = vmatpush.bf16.msra.mxu2 %v1074_v18  ;;  %v1170_v63 = vor.u32 %v1266_v60, %v1167_v62  ;;  %848 = vmatpush.bf16.msrb.mxu3 %v1210_v59  ;;  %v1186_v18 = vor.u32 %v1270_v10, %v1183_v13 }
 0x2df   :  { %832 = vmatpush.bf16.msrb.mxu1 %v1170_v63 }
 0x2e1   :  { %824 = vmatpush.bf16.msra.mxu2 %v1066_v22  ;;  %849 = vmatpush.bf16.msrb.mxu3 %v1202_v4  ;;  %v396_v22 = vperm.slane %v394_v7, 0 }
 0x2e3   :  { %833 = vmatpush.bf16.msrb.mxu1 %v1162_v6 }
 0x2e5   :  { %825 = vmatpush.bf16.msra.mxu2 %v1058_v46  ;;  %850 = vmatpush.bf16.msrb.mxu3 %v1194_v11  ;;  %v1256_v46 = vld [vmem:[%s1887_s5 + $0xa4] sm:$0xf] }
 0x2e6   :  { %v1130_v37 = vor.u32 %v1256_v46, %v1127_v32  ;;  %v1336_v46 = vmov 3  }
 0x2e7   :  { %834 = vmatpush.bf16.msrb.mxu1 %v1154_v12  ;;  %1300 = vset.pattern.permute.xlu2 %v1336_v46 }
 0x2e9   :  { %826 = vmatpush.bf16.msra.mxu2 %v1050_v42  ;;  %851 = vmatpush.bf16.msrb.mxu3 %v1186_v18 }
 0x2eb   :  { %835 = vmatpush.bf16.msrb.mxu1 %v1146_v24 }
 0x2ed   :  { %852 = vmatpush.bf16.msrb.mxu3 %v1178_v25 }
 0x2ef   :  { %836 = vmatpush.bf16.msrb.mxu1 %v1138_v31 }
 0x2f3   :  { %837 = vmatpush.bf16.msrb.mxu1 %v1130_v37 }
 0x2f7   :  { %838 = vmatpush.bf16.msrb.mxu1 %v1122_v45  ;;  %v1280_v45 = vld [vmem:[%s1892_s7] sm:$0xff] }
 0x2fb   :  { %839 = vmatpush.bf16.msrb.mxu1 %v1114_v44 }
 0x329   :  { %v1855_v10 = vpop.permute.xlu2 %867 }
 0x332   :  { %v1860_v17 = vpop.permute.xlu2 %861 }
 0x341   :  { %v1853_v8 = vpop.permute.xlu1 %877 }
 0x349   :  { %v470_v29 = vpop.f32.mrf.mxu0 }
 0x34a   :  { %v471_v30 = vadd.f32 %v470_v29, %v396_v22 }
 0x34c   :  { %v500_v33 = vmax.f32 %v471_v30, 0.0 }
 0x34e   :  { %v503_v35 = vpack.c.bf16 %v500_v33, %v500_v33 }
 0x34f   :  { %v483_v38 = vpop.f32.mrf.mxu2 }
 0x350   :  { %v484_v40 = vadd.f32 %v483_v38, %v397_v34  ;;  %788 = vmatmul.bf16.vlgmr.msra.gmra.mxu3 %v503_v35  ;;  %827 = vmatmul.bf16.vlgmr.msra.gmra.mxu2 %v503_v35 }
 0x351   :  { %v472_v42 = vpop.f32.mrf.mxu0 }
 0x352   :  { %v501_v43 = vmax.f32 %v484_v40, 0.0 }
 0x354   :  { %v504_v48 = vpack.c.bf16 %v501_v43, %v501_v43  ;;  %v1281_v43 = vld [vmem:[%s1892_s7 + $0x8] sm:$0xff]  ;;  %s1340_s7 = smov 126  }
 0x355   :  { %965 = vmatpush.bf16.msra.mxu0 %v1281_v43 }
 0x356   :  { %801 = vmatmul.bf16.vlgmr.msrb.gmra.mxu0 %v504_v48 }
 0x357   :  { %v485_v51 = vpop.f32.mrf.mxu2 }
 0x359   :  { %966 = vmatpush.bf16.msra.mxu0 %v1280_v45 }
 0x35f   :  { %v496_v53 = vpop.f32.mrf.mxu2 }
 0x360   :  { %v497_v54 = vadd.f32 %v496_v53, %v398_v20  ;;  %v1304_v53 = vld [vmem:[%s1891_s8] ss:$0 sm:$0xff] }
 0x362   :  { %v502_v55 = vmax.f32 %v497_v54, 0.0 }
 0x364   :  { %v505_v56 = vpack.c.bf16 %v502_v55, %v502_v55 }
 0x366   :  { %1219 = vmatmul.msk.bf16.vlgmr.msra.gmra.mxu1 %vm776_vm2, %v505_v56  ;;  %1220 = vmatmul.msk.bf16.vlgmr.msrb.gmra.mxu3 %vm776_vm2, %v505_v56 }
 0x367   :  { %v498_v1 = vpop.f32.mrf.mxu2 }
 0x376   :  { %840 = vmatmul.bf16.vlgmr.msrb.gmra.mxu1 %v504_v48 }
 0x3d3   :  { %v789_v0 = vpop.f32.mrf.mxu3  ;;  %v802_v59 = vpop.f32.mrf.mxu0 }
 0x3d4   :  { %v790_v60 = vadd.f32 %v789_v0, %v552_v58  ;;  %v828_v62 = vpop.f32.mrf.mxu2 }
 0x3d5   :  { %v829_v6 = vadd.f32 %v828_v62, %v553_v5 }
 0x3d6   :  { %v803_v2 = vadd.f32 %v802_v59, %v790_v60 }
 0x3db   :  { %v791_v61 = vpop.f32.mrf.mxu3  ;;  %v804_v16 = vpop.f32.mrf.mxu0 }
 0x3dc   :  { %v830_v14 = vpop.f32.mrf.mxu2 }
 0x3e3   :  { %v815_v63 = vpop.f32.mrf.mxu1 }
 0x3e4   :  { %v816_v23 = vadd.f32 %v815_v63, %v803_v2 }
 0x3e6   :  { %v858_v35 = vmax.f32 %v816_v23, 0.0 }
 0x3e9   :  { %v854_v3 = vpop.f32.mrf.mxu3 }
 0x3eb   :  { %v817_v4 = vpop.f32.mrf.mxu1 }
 0x3f1   :  { %v856_v26 = vpop.f32.mrf.mxu3 }
 0x3f3   :  { %v841_v11 = vpop.f32.mrf.mxu1 }
 0x3f4   :  { %v842_v7 = vadd.f32 %v841_v11, %v829_v6 }
 0x3f6   :  { %v855_v9 = vadd.f32 %v854_v3, %v842_v7 }
 0x3f8   :  { %v880_v12 = vmul.f32 %v1853_v8, %v855_v9  ;;  %v870_v13 = vmul.f32 %v1855_v10, %v855_v9  ;;  %v864_v18 = vmul.f32 %v1860_v17, %v855_v9 }
 0x3fa   :  { %882 = vrot.lane.b32.xlu0 %v880_v12, %s1334_s6  ;;  %872 = vrot.lane.b32.xlu1 %v870_v13, %s1335_s4 }
 0x3fb   :  { %v843_v15 = vpop.f32.mrf.mxu1 }
 0x46c   :  { %v873_v19 = vpop.permute.xlu1 %872  ;;  %v883_v22 = vpop.permute.xlu0 %882 }
 0x46d   :  { %v875_v21 = vadd.f32 %v873_v19, %v864_v18 }
 0x46f   :  { %v885_v24 = vadd.f32 %v883_v22, %v875_v21 }
 0x471   :  { %v887_v25 = vsel %vm886_vm3, %v885_v24, -inf }
 0x472   :  { %888 = vmax.xlane.f32.xlu2 %v887_v25 }
 0x4e5   :  { %v889_v27 = vpop.xlane.xlu2 %888 }
 0x4e6   :  { %v890_v28 = vsub.f32 %v885_v24, %v889_v27 }
 0x4e8   :  { %v891_v29 = vmul.f32 1.442695, %v890_v28 }
 0x4ea   :  { %1323 = vpow2.f32 %v891_v29 }
 0x4f0   :  { %v1324_v30 = vpop.eup %1323 }
 0x4f1   :  { %v893_v31 = vsel %vm886_vm3, %v1324_v30, 0.0 }
 0x4f2   :  { %894 = vadd.xlane.f32.xlu1 %v893_v31 }
 0x565   :  { %v895_v32 = vpop.xlane.xlu1 %894 }
 0x566   :  { %1325 = vrcp.f32 %v895_v32 }
 0x56c   :  { %v1326_v33 = vpop.eup %1325 }
 0x56d   :  { %v897_v34 = vmul.f32 %v1326_v33, %v1324_v30 }
 0x56f   :  { %900 = vperm.xlu1 %1301, %v897_v34   ;;  %926 = vperm.xlu2 %1300, %v897_v34  }
 0x570   :  { %906 = vperm.xlu0 %1298, %v897_v34  }
 0x578   :  { %1299 = vset.pattern.permute.xlu0 %v1332_v50 }
 0x579   :  { %916 = vperm.xlu0 %1299, %v897_v34  }
 0x581   :  { %1302 = vset.pattern.permute.xlu0 %v1336_v46 }
 0x5c9   :  { %v927_v40 = vpop.permute.xlu2 %926 }
 0x5ca   :  { %v929_v42 = vmul.f32 %v927_v40, %v858_v35 }
 0x5e1   :  { %v901_v47 = vpop.permute.xlu1 %900 }
 0x5e2   :  { %v907_v37 = vpop.permute.xlu0 %906  ;;  %v903_v44 = vmul.f32 %v901_v47, %v858_v35 }
 0x5e3   :  { %v909_v38 = vmul.f32 %v907_v37, %v858_v35 }
 0x5e5   :  { %911 = vrot.lane.b32.xlu0 %v909_v38, %s1337_s15 }
 0x5eb   :  { %v917_v41 = vpop.permute.xlu0 %916 }
 0x5ec   :  { %v919_v39 = vmul.f32 %v917_v41, %v858_v35 }
 0x5ee   :  { %921 = vrot.lane.b32.xlu0 %v919_v39, %s1338_s16 }
 0x5f6   :  { %931 = vrot.lane.b32.xlu0 %v929_v42, %s1339_s17 }
 0x657   :  { %v912_v36 = vpop.permute.xlu0 %911 }
 0x658   :  { %v914_v49 = vadd.f32 %v912_v36, %v903_v44 }
 0x660   :  { %v922_v48 = vpop.permute.xlu0 %921 }
 0x661   :  { %v924_v51 = vadd.f32 %v922_v48, %v914_v49 }
 0x668   :  { %v932_v50 = vpop.permute.xlu0 %931 }
 0x669   :  { %v934_v52 = vadd.f32 %v932_v50, %v924_v51 }
 0x66b   :  { %v935_v20 = vpack.c.bf16 %v934_v52, %v934_v52 }
 0x66d   :  { %1229 = vmatmul.msk.bf16.vlgmr.msra.gmra.mxu0 %vm42_vm0, %v935_v20  ;;  %vm986_vm0 = vcmask 15360  }
 0x6ea   :  { %v968_v54 = vpop.f32.mrf.mxu0 }
 0x6eb   :  { %v969_v55 = vadd.f32 %v1304_v53, %v968_v54 }
 0x6ed   :  { %v980_v56 = vmul.f32 %v969_v55, %v1853_v8  ;;  %v974_v1 = vmul.f32 %v969_v55, %v1855_v10  ;;  %v972_v0 = vmul.f32 %v969_v55, %v1860_v17 }
 0x6ef   :  { %982 = vrot.lane.b32.xlu1 %v980_v56, %s1335_s4  ;;  %976 = vrot.lane.b32.xlu2 %v974_v1, %s1340_s7 }
 0x6f2   :  { %v970_v57 = vpop.f32.mrf.mxu0 }
 0x749   :  { %v977_v58 = vpop.permute.xlu2 %976 }
 0x74a   :  { %v979_v59 = vadd.f32 %v977_v58, %v972_v0 }
 0x761   :  { %v983_v60 = vpop.permute.xlu1 %982 }
 0x762   :  { %v985_v62 = vadd.f32 %v983_v60, %v979_v59 }
 0x764   :  { %v987_v2 = vsel %vm986_vm0, %v985_v62, -inf }
 0x765   :  { %988 = vmax.xlane.f32.xlu0 %v987_v2 }
 0x7d8   :  { %v989_v61 = vpop.xlane.xlu0 %988 }
 0x7d9   :  { %v990_v16 = vsub.f32 %v985_v62, %v989_v61 }
 0x7db   :  { %v991_v14 = vmul.f32 1.442695, %v990_v16 }
 0x7dd   :  { %1327 = vpow2.f32 %v991_v14 }
 0x7e3   :  { %v1328_v63 = vpop.eup %1327 }
 0x7e4   :  { %v993_v23 = vsel %vm986_vm0, %v1328_v63, 0.0 }
 0x7e5   :  { %994 = vadd.xlane.f32.xlu2 %v993_v23 }
 0x858   :  { %v995_v3 = vpop.xlane.xlu2 %994 }
 0x859   :  { %1329 = vrcp.f32 %v995_v3  ;;  %v1007_v6 = vand.u32 2147483648, %v995_v3  ;;  %v1005_v7 = vand.u32 2147483647, %v995_v3  ;;  %vm1001_vm5 = vweird.f32 %v995_v3 }
 0x85b   :  { %v1008_v9 = vor.u32 1.1754944e-38, %v1007_v6  ;;  %vm1006_vm7 = vcmp.eq.f32.partialorder %v1005_v7, 8.507059e+37 }
 0x85f   :  { %v1330_v4 = vpop.eup %1329 }
 0x860   :  { %v997_v5 = vmul.f32 %v1330_v4, %v995_v3  ;;  %vm1002_vm4 = vweird.f32 %v1330_v4 }
 0x861   :  { %vm1003_vm6 = vmor %vm1001_vm5, %vm1002_vm4 }
 0x862   :  { %v998_v26 = vsub.f32 1.0, %v997_v5 }
 0x864   :  { %v999_v11 = vmul.f32 %v1330_v4, %v998_v26 }
 0x866   :  { %v1000_v8 = vadd.f32 %v1330_v4, %v999_v11 }
 0x868   :  { %v1004_v10 = vsel %vm1003_vm6, %v1330_v4, %v1000_v8 }
 0x869   :  { %v1009_v12 = vsel %vm1006_vm7, %v1008_v9, %v1004_v10 }
 0x86a   :  { %v1010_v13 = vmul.f32 %v1328_v63, %v1009_v12 }
 0x86c   :  { %1011 = vst.msk [vmem:[%s1893_s9] sm:$0xff] %vm986_vm0, %v1010_v13 }

</bundles_post_ra>
